<compile_context>
chip_gen: v6e
topology: v6e:2x2x1
jax: 0.10.0
libtpu: 0.0.40
codegen_flags: <defaults>
</compile_context>

<pallas_src>
import functools

import numpy as np

import jax
import jax.numpy as jnp
from jax import lax
from jax.experimental import pallas as pl
from jax.experimental.pallas import tpu as pltpu


# ---------------------------------------------------------------------------
# Kernel
# ---------------------------------------------------------------------------
def _gaussian_net_kernel(x_ref, w1_ref, b1_ref, wh_ref, bh_ref, out_ref, *,
                         out_dim, mm_dtype):
    # Cast x in-kernel (avoids a separate XLA astype pass over x in HBM);
    # MXU accumulates in f32 via preferred_element_type regardless.
    x = x_ref[...].astype(mm_dtype)
    h = jnp.dot(x, w1_ref[...], preferred_element_type=jnp.float32)
    # Elementwise epilogue stays f32 (v5e VPU/EUP have no bf16).
    h = jnp.maximum(h + b1_ref[...], 0.0)

    # Fused head projection: one matmul producing [mean | logvar] groups.
    y = jnp.dot(h.astype(wh_ref.dtype), wh_ref[...],
                preferred_element_type=jnp.float32) + bh_ref[...]

    # activ (tanh) on the mean columns only, via a lane mask so the final store
    # remains one full-width slab store.  With the packed layout the columns are
    # P repeated groups of [mean (out_dim) | logvar (out_dim)].
    cols = lax.broadcasted_iota(jnp.int32, y.shape, dimension=1)
    mean_mask = (cols % (2 * out_dim)) < out_dim
    y = jnp.where(mean_mask, jnp.tanh(y), y)
    out_ref[...] = y.astype(out_ref.dtype)


# ---------------------------------------------------------------------------
# Wrapper helpers
# ---------------------------------------------------------------------------
_TB_MAX = 1024  # rows per grid step; a (1024, 128) f32 tile is 512 KiB, so
                # double-buffered x + out stay ~2 MiB -- well under the 32 MiB
                # scoped-VMEM default (and v7x's 64 MiB physical VMEM).


def _pick_batch_tile(rows):
    """Largest useful row tile; ensures >= 2 grid steps when possible (v7x has
    2 TensorCores, a grid of 1 would idle one of them)."""
    if rows <= 8:
        return rows  # single full-extent block (allowed: equals full array dim)
    half = -(-rows // 2)                       # ceil(rows / 2)
    return min(_TB_MAX, ((half + 7) // 8) * 8)  # keep sublane dim a multiple of 8


def _pack_factor(in_dim, hid_dim, out2):
    """How many batch rows to pack per 128-lane row (block-diagonal weights)."""
    m = max(in_dim, hid_dim, out2)
    if m >= 128:
        return 1
    return max(1, 128 // m)


def _block_diag(w, p):
    if p == 1:
        return w
    k, n = w.shape
    out = jnp.zeros((p * k, p * n), w.dtype)
    for i in range(p):
        out = out.at[i * k:(i + 1) * k, i * n:(i + 1) * n].set(w)
    return out


# ---------------------------------------------------------------------------
# Public entry point
# ---------------------------------------------------------------------------
def gaussian_net(x, w1, b1, wm, bm, wl, bl, *,
                 matmul_dtype=jnp.bfloat16, out_dtype=jnp.float32):
    """Fused GaussianNet forward.  Weights stored as (in, out): y = x @ W + b
    (== PyTorch x @ W.T).  Returns (mean, logvar).

    In production this whole function should sit under jit so the (tiny)
    weight-prep ops (concat / block-diag / casts) are hoisted & fused.
    """
    B, in_dim = x.shape
    hid_dim = w1.shape[1]
    O = wm.shape[1]
    out2 = 2 * O

    # Fuse the two heads: one (H, 2*O) weight and one (1, 2*O) bias.
    w_heads = jnp.concatenate([wm, wl], axis=1)
    b_heads = jnp.concatenate([bm, bl], axis=1)

    # Lane-densify small feature dims by packing P batch rows per 128-lane row
    # via block-diagonal weights (reshape of x is layout-free, no extra copy).
    P = _pack_factor(in_dim, hid_dim, out2)
    if P > 1 and B % P != 0:
        P = 1
    if P > 1:
        x_in = x.reshape(B // P, P * in_dim)
        w1_k = _block_diag(w1, P)
        wh_k = _block_diag(w_heads, P)
        b1_k = jnp.tile(b1, (1, P))
        bh_k = jnp.tile(b_heads, (1, P))
    else:
        x_in, w1_k, wh_k, b1_k, bh_k = x, w1, w_heads, b1, b_heads

    rows, width_in = x_in.shape
    width_out = wh_k.shape[1]

    # bf16 matmul operands (weights are tiny); biases stay f32 for the epilogue.
    w1_mm = w1_k.astype(matmul_dtype)
    wh_mm = wh_k.astype(matmul_dtype)
    b1_f32 = b1_k.astype(jnp.float32)
    bh_f32 = bh_k.astype(jnp.float32)

    TB = _pick_batch_tile(rows)
    grid = (pl.cdiv(rows, TB),)   # ragged last block is fine: rows are independent

    # Weights/biases: constant index_map -> resident in VMEM across grid steps.
    def resident(a):
        return pl.BlockSpec(a.shape, lambda i: (0,) * a.ndim)

    cost = pl.CostEstimate(
        flops=int(2 * B * (in_dim * hid_dim + hid_dim * out2)),
        transcendentals=int(B * out2),
        bytes_accessed=int(
            x.size * x.dtype.itemsize
            + B * out2 * np.dtype(out_dtype).itemsize
            + (w1_mm.size + wh_mm.size) * np.dtype(matmul_dtype).itemsize
            + (b1_f32.size + bh_f32.size) * 4),
    )

    out = pl.pallas_call(
        functools.partial(_gaussian_net_kernel, out_dim=O, mm_dtype=matmul_dtype),
        out_shape=jax.ShapeDtypeStruct((rows, width_out), out_dtype),
        grid=grid,
        in_specs=[
            pl.BlockSpec((TB, width_in), lambda i: (i, 0)),  # x tiled over batch
            resident(w1_mm),
            resident(b1_f32),
            resident(wh_mm),
            resident(bh_f32),
        ],
        out_specs=pl.BlockSpec((TB, width_out), lambda i: (i, 0)),
        compiler_params=pltpu.CompilerParams(
            # Batch axis is independent -> shard across both TCs on v7x megacore.
            dimension_semantics=("parallel",),
            vmem_limit_bytes=32 * 1024 * 1024,
        ),
        cost_estimate=cost,
    )(x_in, w1_mm, b1_f32, wh_mm, bh_f32)

    out = out.reshape(B, out2)     # layout-free un-pack of the lane-dense slab
    return out[:, :O], out[:, O:]


# ---------------------------------------------------------------------------
# Params / reference
# ---------------------------------------------------------------------------
def init_params(key, input_dim, hid_dim, out_dim):
    """Deterministic parameter init (Kaiming-uniform-ish scale like nn.Linear)."""
    k1, k2, k3, k4, k5, k6 = jax.random.split(key, 6)

    def lin(kw, kb, fan_in, fan_out):
        bound = 1.0 / jnp.sqrt(fan_in)
        w = jax.random.uniform(kw, (fan_in, fan_out), jnp.float32, -bound, bound)
        b = jax.random.uniform(kb, (1, fan_out), jnp.float32, -bound, bound)
        return w, b

    w1, b1 = lin(k1, k2, input_dim, hid_dim)
    wm, bm = lin(k3, k4, hid_dim, out_dim)
    wl, bl = lin(k5, k6, hid_dim, out_dim)
    return w1, b1, wm, bm, wl, bl


def _reference(x, w1, b1, wm, bm, wl, bl):
    hp = lax.Precision.HIGHEST
    h = jnp.maximum(jnp.dot(x, w1, precision=hp) + b1, 0.0)
    mean = jnp.tanh(jnp.dot(h, wm, precision=hp) + bm)
    logvar = jnp.dot(h, wl, precision=hp) + bl
    return mean, logvar


# ---------------------------------------------------------------------------
# Self-test
# ---------------------------------------------------------------------------
if __name__ == "__main__":
    # Small shapes consistent with the module's forward.
    batch, input_dim, hid_dim, out_dim = 8, 32, 32, 16

    key = jax.random.PRNGKey(0)
    kx, kp, kx2, kx3 = jax.random.split(key, 4)
    x = jax.random.normal(kx, (batch, input_dim), jnp.float32)
    params = init_params(kp, input_dim, hid_dim, out_dim)
    mean_ref, logvar_ref = _reference(x, *params)

    # 1) f32 matmul operands (packed lane-dense path) -- strict tolerance.
    mean, logvar = gaussian_net(x, *params, matmul_dtype=jnp.float32)
    jax.block_until_ready((mean, logvar))
    assert jnp.allclose(mean, mean_ref, atol=1e-4), "mean mismatch (f32)"
    assert jnp.allclose(logvar, logvar_ref, atol=1e-4), "logvar mismatch (f32)"

    # 2) Default bf16 MXU operands -- relaxed tolerance.
    mean_bf, logvar_bf = gaussian_net(x, *params)
    jax.block_until_ready((mean_bf, logvar_bf))
    assert jnp.allclose(mean_bf, mean_ref, atol=3e-2, rtol=3e-2), "mean mismatch (bf16)"
    assert jnp.allclose(logvar_bf, logvar_ref, atol=3e-2, rtol=3e-2), "logvar mismatch (bf16)"

    # 3) bf16 output path (halves writeback traffic).
    mean_o, logvar_o = gaussian_net(x, *params, out_dtype=jnp.bfloat16)
    jax.block_until_ready((mean_o, logvar_o))
    assert mean_o.dtype == jnp.bfloat16 and logvar_o.dtype == jnp.bfloat16
    assert jnp.allclose(mean_o.astype(jnp.float32), mean_ref, atol=5e-2, rtol=5e-2)
    assert jnp.allclose(logvar_o.astype(jnp.float32), logvar_ref, atol=5e-2, rtol=5e-2)

    # 4) Larger batch: exercises the ragged cdiv grid + 2-step "parallel" axis
    #    (B=1000 -> 250 packed rows -> TB=128, grid=(2,), ragged last block).
    xb = jax.random.normal(kx2, (1000, input_dim), jnp.float32)
    mean_b, logvar_b = gaussian_net(xb, *params, matmul_dtype=jnp.float32)
    jax.block_until_ready((mean_b, logvar_b))
    mean_b_ref, logvar_b_ref = _reference(xb, *params)
    assert jnp.allclose(mean_b, mean_b_ref, atol=1e-4), "mean mismatch (batched)"
    assert jnp.allclose(logvar_b, logvar_b_ref, atol=1e-4), "logvar mismatch (batched)"

    # 5) Batch not divisible by the pack factor -> plain (un-packed) fallback,
    #    still ragged cdiv grid (B=514 -> TB=264, grid=(2,)).
    xc = jax.random.normal(kx3, (514, input_dim), jnp.float32)
    mean_c, logvar_c = gaussian_net(xc, *params, matmul_dtype=jnp.float32)
    jax.block_until_ready((mean_c, logvar_c))
    mean_c_ref, logvar_c_ref = _reference(xc, *params)
    assert jnp.allclose(mean_c, mean_c_ref, atol=1e-4), "mean mismatch (fallback)"
    assert jnp.allclose(logvar_c, logvar_c_ref, atol=1e-4), "logvar mismatch (fallback)"

    print("KERNEL_OK")
</pallas_src>

<mosaic_0001>
module attributes {stable_mosaic.version = 11 : i64} {
  func.func @_gaussian_net_kernel(%arg0: i32, %arg1: memref<2x128xf32, #tpu.memory_space<vmem>>, %arg2: memref<128x128xf32, #tpu.memory_space<vmem>>, %arg3: memref<1x128xf32, #tpu.memory_space<vmem>>, %arg4: memref<128x128xf32, #tpu.memory_space<vmem>>, %arg5: memref<1x128xf32, #tpu.memory_space<vmem>>, %arg6: memref<2x128xf32, #tpu.memory_space<vmem>>) attributes {dimension_semantics = [#tpu.dimension_semantics<parallel>], iteration_bounds = array<i64: 1>, scalar_prefetch = 0 : i64, scratch_operands = 0 : i64, tpu.core_type = #tpu.core_type<tc>, window_params = [{transform_indices = @transform_0, window_bounds = array<i64: 2, 128>}, {pipeline_mode = #tpu.pipeline_mode<synchronous>, transform_indices = @transform_1, window_bounds = array<i64: 128, 128>}, {pipeline_mode = #tpu.pipeline_mode<synchronous>, transform_indices = @transform_2, window_bounds = array<i64: 1, 128>}, {pipeline_mode = #tpu.pipeline_mode<synchronous>, transform_indices = @transform_3, window_bounds = array<i64: 128, 128>}, {pipeline_mode = #tpu.pipeline_mode<synchronous>, transform_indices = @transform_4, window_bounds = array<i64: 1, 128>}, {transform_indices = @transform_5, window_bounds = array<i64: 2, 128>}]} {
    %c0 = arith.constant 0 : index
    %c0_0 = arith.constant 0 : index
    %0 = vector.load %arg1[%c0, %c0_0] : memref<2x128xf32, #tpu.memory_space<vmem>>, vector<2x128xf32>
    %c0_1 = arith.constant 0 : index
    %c0_2 = arith.constant 0 : index
    %1 = vector.load %arg2[%c0_1, %c0_2] : memref<128x128xf32, #tpu.memory_space<vmem>>, vector<128x128xf32>
    %cst = arith.constant dense<0.000000e+00> : vector<2x128xf32>
    %2 = tpu.matmul %0, %1, %cst {dimension_numbers = #tpu.dot_dimension_numbers<[1], [0], [0], [1], [0, 0, 1, 1], [], []>} : vector<2x128xf32>, vector<128x128xf32>, vector<2x128xf32> -> vector<2x128xf32>
    %c0_3 = arith.constant 0 : index
    %c0_4 = arith.constant 0 : index
    %3 = vector.load %arg3[%c0_3, %c0_4] : memref<1x128xf32, #tpu.memory_space<vmem>>, vector<1x128xf32>
    %4 = vector.broadcast %3 : vector<1x128xf32> to vector<2x128xf32>
    %5 = arith.addf %2, %4 : vector<2x128xf32>
    %cst_5 = arith.constant 0.000000e+00 : f32
    %6 = vector.broadcast %cst_5 : f32 to vector<2x128xf32>
    %7 = arith.maximumf %5, %6 : vector<2x128xf32>
    %c0_6 = arith.constant 0 : index
    %c0_7 = arith.constant 0 : index
    %8 = vector.load %arg4[%c0_6, %c0_7] : memref<128x128xf32, #tpu.memory_space<vmem>>, vector<128x128xf32>
    %cst_8 = arith.constant dense<0.000000e+00> : vector<2x128xf32>
    %9 = tpu.matmul %7, %8, %cst_8 {dimension_numbers = #tpu.dot_dimension_numbers<[1], [0], [0], [1], [0, 0, 1, 1], [], []>} : vector<2x128xf32>, vector<128x128xf32>, vector<2x128xf32> -> vector<2x128xf32>
    %c0_9 = arith.constant 0 : index
    %c0_10 = arith.constant 0 : index
    %10 = vector.load %arg5[%c0_9, %c0_10] : memref<1x128xf32, #tpu.memory_space<vmem>>, vector<1x128xf32>
    %11 = vector.broadcast %10 : vector<1x128xf32> to vector<2x128xf32>
    %12 = arith.addf %9, %11 : vector<2x128xf32>
    %13 = tpu.iota {dimensions = array<i32: 1>} : vector<2x128xi32>
    %c32_i32 = arith.constant 32 : i32
    %c0_i32 = arith.constant 0 : i32
    %14 = arith.cmpi eq, %c32_i32, %c0_i32 : i32
    %c1_i32 = arith.constant 1 : i32
    %15 = arith.select %14, %c1_i32, %c32_i32 : i32
    %16 = vector.broadcast %15 : i32 to vector<2x128xi32>
    %17 = arith.remsi %13, %16 : vector<2x128xi32>
    %c0_i32_11 = arith.constant 0 : i32
    %18 = vector.broadcast %c0_i32_11 : i32 to vector<2x128xi32>
    %19 = arith.cmpi ne, %17, %18 : vector<2x128xi32>
    %c0_i32_12 = arith.constant 0 : i32
    %20 = vector.broadcast %c0_i32_12 : i32 to vector<2x128xi32>
    %21 = arith.cmpi slt, %17, %20 : vector<2x128xi32>
    %c0_i32_13 = arith.constant 0 : i32
    %22 = arith.cmpi slt, %15, %c0_i32_13 : i32
    %23 = vector.broadcast %22 : i1 to vector<2x128xi1>
    %24 = vector.broadcast %23 : vector<2x128xi1> to vector<2x128xi1>
    %25 = arith.xori %21, %24 : vector<2x128xi1>
    %26 = arith.andi %25, %19 : vector<2x128xi1>
    %27 = vector.broadcast %15 : i32 to vector<2x128xi32>
    %28 = arith.addi %17, %27 : vector<2x128xi32>
    %29 = arith.select %26, %28, %17 : vector<2x128xi1>, vector<2x128xi32>
    %c16_i32 = arith.constant 16 : i32
    %30 = vector.broadcast %c16_i32 : i32 to vector<2x128xi32>
    %31 = arith.cmpi slt, %29, %30 : vector<2x128xi32>
    %32 = math.tanh %12 : vector<2x128xf32>
    %33 = arith.select %31, %32, %12 : vector<2x128xi1>, vector<2x128xf32>
    %c0_14 = arith.constant 0 : index
    %c0_15 = arith.constant 0 : index
    %34 = vector.load %arg6[%c0_14, %c0_15] : memref<2x128xf32, #tpu.memory_space<vmem>>, vector<2x128xf32>
    tpu.vector_store %arg6[%c0_14, %c0_15], %33 {strides = array<i32>} : memref<2x128xf32, #tpu.memory_space<vmem>>, vector<2x128xf32>,
    return
  }
  func.func @transform_0(%arg0: i32) -> (i32, i32) {
    %c0_i32 = arith.constant 0 : i32
    %c0_i32_0 = arith.constant 0 : i32
    return %arg0, %c0_i32 : i32, i32
  }
  func.func @transform_1(%arg0: i32) -> (i32, i32) {
    %c0_i32 = arith.constant 0 : i32
    %c0_i32_0 = arith.constant 0 : i32
    %c0_i32_1 = arith.constant 0 : i32
    return %c0_i32, %c0_i32_0 : i32, i32
  }
  func.func @transform_2(%arg0: i32) -> (i32, i32) {
    %c0_i32 = arith.constant 0 : i32
    %c0_i32_0 = arith.constant 0 : i32
    %c0_i32_1 = arith.constant 0 : i32
    return %c0_i32, %c0_i32_0 : i32, i32
  }
  func.func @transform_3(%arg0: i32) -> (i32, i32) {
    %c0_i32 = arith.constant 0 : i32
    %c0_i32_0 = arith.constant 0 : i32
    %c0_i32_1 = arith.constant 0 : i32
    return %c0_i32, %c0_i32_0 : i32, i32
  }
  func.func @transform_4(%arg0: i32) -> (i32, i32) {
    %c0_i32 = arith.constant 0 : i32
    %c0_i32_0 = arith.constant 0 : i32
    %c0_i32_1 = arith.constant 0 : i32
    return %c0_i32, %c0_i32_0 : i32, i32
  }
  func.func @transform_5(%arg0: i32) -> (i32, i32) {
    %c0_i32 = arith.constant 0 : i32
    %c0_i32_0 = arith.constant 0 : i32
    return %arg0, %c0_i32 : i32, i32
  }
}

</mosaic_0001>

<bundles_post_ra>
// kernel: tpu_custom_call.1
= control target key start
LH: loop header
LB: loop body
LE: loop exit
PB: predicated region body
PF: predicated region fallthrough
CT: control target
= control target key end

     0   :  { %10 = vsyncpa [#allocation3], 0  ;;  %s574_s0 = inlined_call_operand.hbm [shape: f32[2,128], index: 0, kind: input, shape index: {}]   ;;  %s575_s1 = inlined_call_operand.hbm [shape: f32[128,128], index: 1, kind: input, shape index: {}]   ;;  %s576_s2 = inlined_call_operand.vmem [shape: f32[1,128], index: 2, kind: input, shape index: {}]   ;;  %s577_s3 = inlined_call_operand.hbm [shape: f32[128,128], index: 3, kind: input, shape index: {}]   ;;  %s578_s4 = inlined_call_operand.vmem [shape: f32[1,128], index: 4, kind: input, shape index: {}]   ;;  %s579_s5 = inlined_call_operand.hbm [shape: f32[2,128], index: 5, kind: output, shape index: {}]  }
   0x1   :  { %11 = vsyncpa [#allocation6], 0 }
   0x2   :  { %12 = vsyncpa [#allocation4], 0  ;;  %s484_s18 = smov [#allocation5]  }
   0x3   :  { %s28_s19 = sshll.u32 %s484_s18, 4  ;;  %s29_s19 = int_to_ptr.vmem [resolvable:$true] %s28_s19 }
   0x4   :  { %s406_s20 = scalar_lea.vmem %s29_s19, 2048  ;;  %p411_p1 = scmp.lt.s32.totalorder %s29_s19, %s29_s19 }
   0x5   :  { %p407_p0 = scmp.ne.s32.totalorder %s29_s19, %s406_s20  ;;  %p412_p2 = scmp.lt.s32.totalorder %s406_s20, %s406_s20 }
   0x7   :  { %p413_p3 = por %p412_p2, %p411_p1 }
   0x9   :  { %p414_p4 = pnand %p413_p3, %p407_p0 }
   0xb   :  { %417 = shalt.err (!%p414_p4)
}
   0xc   :  { %s485_s21 = smov 128   ;;  %s486_s22 = smov 8  }
   0xd   :  { %34 = dma.hbm_to_vmem [thread:$0]  %s575_s1, 2048, %s29_s19, [#allocation6], %s485_s21, %s485_s21, %s486_s22  }
   0xe   :  { %s487_s25 = smov [#allocation2]   ;;  %s488_s27 = smov [#allocation7]  }
   0xf   :  { %s19_s26 = sshll.u32 %s487_s25, 4  ;;  %s42_s28 = sshll.u32 %s488_s27, 4  ;;  %s20_s26 = int_to_ptr.vmem [resolvable:$true] %s19_s26  ;;  %s43_s28 = int_to_ptr.vmem [resolvable:$true] %s42_s28 }
  0x10   :  { %s426_s29 = scalar_lea.vmem %s20_s26, 32  ;;  %p431_p6 = scmp.lt.s32.totalorder %s20_s26, %s20_s26 }
  0x11   :  { %p427_p5 = scmp.ne.s32.totalorder %s20_s26, %s426_s29  ;;  %p432_p7 = scmp.lt.s32.totalorder %s426_s29, %s426_s29 }
  0x13   :  { %p433_p8 = por %p432_p7, %p431_p6 }
  0x15   :  { %p434_p9 = pnand %p433_p8, %p427_p5 }
  0x17   :  { %437 = shalt.err (!%p434_p9)
}
  0x18   :  { %22 = dma.hbm_to_vmem [thread:$0]  %s574_s0, 32, %s20_s26, [#allocation3]  }
  0x19   :  { %s446_s7 = scalar_lea.vmem %s43_s28, 2048  ;;  %p451_p11 = scmp.lt.s32.totalorder %s43_s28, %s43_s28 }
  0x1a   :  { %p447_p10 = scmp.ne.s32.totalorder %s43_s28, %s446_s7  ;;  %p452_p12 = scmp.lt.s32.totalorder %s446_s7, %s446_s7 }
  0x1c   :  { %p453_p13 = por %p452_p12, %p451_p11 }
  0x1e   :  { %p454_p0 = pnand %p453_p13, %p447_p10 }
  0x20   :  { %457 = shalt.err (!%p454_p0)
}
  0x21   :  { %48 = dma.hbm_to_vmem [thread:$0]  %s577_s3, 2048, %s43_s28, [#allocation6], %s485_s21, %s485_s21, %s486_s22  }
  0x22   :  { %478 = dma.done.wait [#allocation3], 32  }
  0x23   :  { %479 = vsyncadd [#allocation3], 4294967264 }
  0x24   :  { %480 = dma.done.wait [#allocation6], 4096  }
  0x25   :  { %481 = vsyncadd [#allocation6], 4294963200  ;;  %v489_v0 = vmov 0.0   ;;  %vm490_vm0 = vmmov 0   ;;  %v76_v1 = vld [vmem:[#allocation5 + $0x78] sm:$0xff]  ;;  %v75_v2 = vld [vmem:[#allocation5 + $0x70] sm:$0xff]  ;;  %v248_v43 = vlaneseq }
  0x26   :  { %318 = vmatprep.subr.mxu0 %v489_v0  ;;  %350 = vmatprep.mubr.msk.f32.mxu0 %vm490_vm0, %v489_v0  ;;  %v74_v3 = vld [vmem:[#allocation5 + $0x68] sm:$0xff]  ;;  %v73_v4 = vld [vmem:[#allocation5 + $0x60] sm:$0xff]  ;;  %v170_v5 = vld [vmem:[#allocation7 + $0x78] sm:$0xff]  ;;  %s491_s11 = smov [#allocation8]  }
  0x27   :  { %353 = vmatprep.subr.mxu1 %v489_v0  ;;  %385 = vmatprep.mubr.msk.f32.mxu1 %vm490_vm0, %v489_v0  ;;  %v72_v6 = vld [vmem:[#allocation5 + $0x58] sm:$0xff]  ;;  %v169_v7 = vld [vmem:[#allocation7 + $0x70] sm:$0xff]  ;;  %v168_v8 = vld [vmem:[#allocation7 + $0x68] sm:$0xff]  ;;  %v249_v44 = vand.u32 127, %v248_v43  ;;  %s272_s12 = sshll.u32 %s491_s11, 4  ;;  %s273_s12 = int_to_ptr.vmem [resolvable:$true] %s272_s12 }
  0x28   :  { %319 = vmatpush3.msra.mxu0 %v76_v1  ;;  %354 = vmatpush3.msra.mxu1 %v170_v5  ;;  %v71_v9 = vld [vmem:[#allocation5 + $0x50] sm:$0xff]  ;;  %v167_v10 = vld [vmem:[#allocation7 + $0x60] sm:$0xff]  ;;  %v70_v11 = vld [vmem:[#allocation5 + $0x48] sm:$0xff]  ;;  %p463_p2 = scmp.lt.s32.totalorder %s273_s12, %s273_s12 }
  0x29   :  { %320 = vmatprep.subr.mxu0 %v489_v0  ;;  %355 = vmatprep.subr.mxu1 %v489_v0  ;;  %v166_v12 = vld [vmem:[#allocation7 + $0x58] sm:$0xff]  ;;  %v69_v13 = vld [vmem:[#allocation5 + $0x40] sm:$0xff]  ;;  %v165_v14 = vld [vmem:[#allocation7 + $0x50] sm:$0xff]  ;;  %v254_v45 = vand.u32 31, %v249_v44 }
  0x2a   :  { %321 = vmatpush3.msra.mxu0 %v75_v2  ;;  %356 = vmatpush3.msra.mxu1 %v169_v7  ;;  %v68_v15 = vld [vmem:[#allocation5 + $0x38] sm:$0xff]  ;;  %v164_v16 = vld [vmem:[#allocation7 + $0x48] sm:$0xff]  ;;  %v67_v17 = vld [vmem:[#allocation5 + $0x30] sm:$0xff] }
  0x2b   :  { %322 = vmatprep.subr.mxu0 %v489_v0  ;;  %357 = vmatprep.subr.mxu1 %v489_v0  ;;  %v163_v18 = vld [vmem:[#allocation7 + $0x40] sm:$0xff]  ;;  %v66_v19 = vld [vmem:[#allocation5 + $0x28] sm:$0xff]  ;;  %v162_v20 = vld [vmem:[#allocation7 + $0x38] sm:$0xff]  ;;  %vm262_vm1 = vcmp.lt.s32.totalorder %v254_v45, 16 }
  0x2c   :  { %323 = vmatpush3.msra.mxu0 %v74_v3  ;;  %358 = vmatpush3.msra.mxu1 %v168_v8  ;;  %v65_v21 = vld [vmem:[#allocation5 + $0x20] sm:$0xff]  ;;  %v161_v22 = vld [vmem:[#allocation7 + $0x30] sm:$0xff]  ;;  %v64_v23 = vld [vmem:[#allocation5 + $0x18] sm:$0xff] }
  0x2d   :  { %324 = vmatprep.subr.mxu0 %v489_v0  ;;  %359 = vmatprep.subr.mxu1 %v489_v0  ;;  %v160_v24 = vld [vmem:[#allocation7 + $0x28] sm:$0xff]  ;;  %v63_v25 = vld [vmem:[#allocation5 + $0x10] sm:$0xff]  ;;  %v159_v26 = vld [vmem:[#allocation7 + $0x20] sm:$0xff] }
  0x2e   :  { %325 = vmatpush3.msra.mxu0 %v73_v4  ;;  %360 = vmatpush3.msra.mxu1 %v167_v10  ;;  %v62_v27 = vld [vmem:[#allocation5 + $0x8] sm:$0xff]  ;;  %v158_v28 = vld [vmem:[#allocation7 + $0x18] sm:$0xff]  ;;  %v61_v29 = vld [vmem:[#allocation5] sm:$0xff] }
  0x2f   :  { %326 = vmatprep.subr.mxu0 %v489_v0  ;;  %361 = vmatprep.subr.mxu1 %v489_v0  ;;  %v60_v30 = vld [vmem:[#allocation2] sm:$0x3]  ;;  %v157_v31 = vld [vmem:[#allocation7 + $0x10] sm:$0xff]  ;;  %v156_v32 = vld [vmem:[#allocation7 + $0x8] sm:$0xff] }
  0x30   :  { %327 = vmatpush3.msra.mxu0 %v72_v6  ;;  %362 = vmatpush3.msra.mxu1 %v166_v12  ;;  %v155_v33 = vld [vmem:[#allocation7] sm:$0xff]  ;;  %v282_v34 = vld [vmem:[%s576_s2] ss:$0 sm:$0xff]  ;;  %s458_s2 = scalar_lea.vmem %s273_s12, 32 }
  0x31   :  { %328 = vmatprep.subr.mxu0 %v489_v0  ;;  %363 = vmatprep.subr.mxu1 %v489_v0  ;;  %v283_v39 = vld [vmem:[%s578_s4] ss:$0 sm:$0xff]  ;;  %p459_p1 = scmp.ne.s32.totalorder %s273_s12, %s458_s2  ;;  %p464_p3 = scmp.lt.s32.totalorder %s458_s2, %s458_s2 }
  0x32   :  { %329 = vmatpush3.msra.mxu0 %v71_v9  ;;  %364 = vmatpush3.msra.mxu1 %v165_v14 }
  0x33   :  { %330 = vmatprep.subr.mxu0 %v489_v0  ;;  %365 = vmatprep.subr.mxu1 %v489_v0  ;;  %p465_p4 = por %p464_p3, %p463_p2 }
  0x34   :  { %331 = vmatpush3.msra.mxu0 %v70_v11  ;;  %366 = vmatpush3.msra.mxu1 %v164_v16 }
  0x35   :  { %332 = vmatprep.subr.mxu0 %v489_v0  ;;  %367 = vmatprep.subr.mxu1 %v489_v0  ;;  %p466_p5 = pnand %p465_p4, %p459_p1 }
  0x36   :  { %333 = vmatpush3.msra.mxu0 %v69_v13  ;;  %368 = vmatpush3.msra.mxu1 %v163_v18 }
  0x37   :  { %334 = vmatprep.subr.mxu0 %v489_v0  ;;  %369 = vmatprep.subr.mxu1 %v489_v0 }
  0x38   :  { %335 = vmatpush3.msra.mxu0 %v68_v15  ;;  %370 = vmatpush3.msra.mxu1 %v162_v20 }
  0x39   :  { %336 = vmatprep.subr.mxu0 %v489_v0  ;;  %371 = vmatprep.subr.mxu1 %v489_v0 }
  0x3a   :  { %337 = vmatpush3.msra.mxu0 %v67_v17  ;;  %372 = vmatpush3.msra.mxu1 %v161_v22 }
  0x3b   :  { %338 = vmatprep.subr.mxu0 %v489_v0  ;;  %373 = vmatprep.subr.mxu1 %v489_v0 }
  0x3c   :  { %339 = vmatpush3.msra.mxu0 %v66_v19  ;;  %374 = vmatpush3.msra.mxu1 %v160_v24 }
  0x3d   :  { %340 = vmatprep.subr.mxu0 %v489_v0  ;;  %375 = vmatprep.subr.mxu1 %v489_v0 }
  0x3e   :  { %341 = vmatpush3.msra.mxu0 %v65_v21  ;;  %376 = vmatpush3.msra.mxu1 %v159_v26 }
  0x3f   :  { %342 = vmatprep.subr.mxu0 %v489_v0  ;;  %377 = vmatprep.subr.mxu1 %v489_v0 }
  0x40   :  { %343 = vmatpush3.msra.mxu0 %v64_v23  ;;  %378 = vmatpush3.msra.mxu1 %v158_v28 }
  0x41   :  { %344 = vmatprep.subr.mxu0 %v489_v0  ;;  %379 = vmatprep.subr.mxu1 %v489_v0 }
  0x42   :  { %345 = vmatpush3.msra.mxu0 %v63_v25  ;;  %380 = vmatpush3.msra.mxu1 %v157_v31 }
  0x43   :  { %346 = vmatprep.subr.mxu0 %v489_v0  ;;  %381 = vmatprep.subr.mxu1 %v489_v0 }
  0x44   :  { %347 = vmatpush3.msra.mxu0 %v62_v27  ;;  %382 = vmatpush3.msra.mxu1 %v156_v32 }
  0x45   :  { %348 = vmatprep.subr.mxu0 %v489_v0  ;;  %383 = vmatprep.subr.mxu1 %v489_v0 }
  0x46   :  { %349 = vmatpush3.msra.mxu0 %v61_v29  ;;  %384 = vmatpush3.msra.mxu1 %v155_v33 }
  0x47   :  { %351 = vmatmul.mubr.f32.vlgmr.msra.gmra.mxu0 %v60_v30 }
 0x107   :  { %v150_v35 = vpop.f32.mrf.mxu0 }
 0x108   :  { %v151_v36 = vadd.f32 %v282_v34, %v150_v35 }
 0x109   :  { %v352_v37 = vpop.f32.mrf.mxu0 }
 0x10a   :  { %v154_v38 = vmax.f32 %v151_v36, 0.0 }
 0x10c   :  { %386 = vmatmul.mubr.f32.vlgmr.msra.gmra.mxu1 %v154_v38 }
 0x1cc   :  { %v244_v40 = vpop.f32.mrf.mxu1 }
 0x1cd   :  { %v245_v41 = vadd.f32 %v283_v39, %v244_v40 }
 0x1ce   :  { %v387_v42 = vpop.f32.mrf.mxu1 }
 0x1cf   :  { %396 = vtanh.f32 %v245_v41 }
 0x1dc   :  { %v397_v46 = vpop.eup %396 }
 0x1dd   :  { %v264_v47 = vsel %vm262_vm1, %v397_v46, %v245_v41 }
 0x1de   :  { %265 = vst [vmem:[#allocation8] sm:$0x3] %v264_v47 }
 0x1df   :  { %469 = shalt.err (!%p466_p5)
}
 0x1e0   :  { %275 = dma.vmem_to_hbm [thread:$0]  %s273_s12, 32, %s579_s5, [#allocation4]  }
 0x1e1   :  { %482 = dma.done.wait [#allocation4], 32  }
 0x1e2   :  { %483 = vsyncadd [#allocation4], 4294967264 }
 0x1e3   :  { %279 = vsyncpa [#allocation3], 1 }
 0x1e4   :  { %280 = vsyncpa [#allocation6], 1 }
 0x1e5   :  { %281 = vsyncpa [#allocation4], 1 }

</bundles_post_ra>
